<compile_context>
chip_gen: v5e
topology: v5e:2x2
jax: 0.10.0
libtpu: 0.0.40
codegen_flags: <defaults>
</compile_context>

<pallas_src>
import jax
import jax.numpy as jnp
from jax.experimental import pallas as pl
from jax.experimental.pallas import tpu as pltpu


def residual_kernel(x_ref, w_ref, b_ref, o_ref):
    # x_ref : (1, R, T)  activation slab (R = folded_batches * C rows, T = spatial lanes)
    # w_ref : (R, R)     gamma-folded, block-diagonal 1x1-conv weight (VMEM, feeds MXU)
    # b_ref : (R, 1)     gamma-folded bias column
    # o_ref : (1, R, T)  output slab
    x2 = x_ref[0].astype(jnp.float32)                       # single whole-block load
    r = jnp.dot(w_ref[...].astype(jnp.float32), x2,
                preferred_element_type=jnp.float32)          # MXU; VPU stays free
    out = x2 + r + b_ref[...].astype(jnp.float32)            # skip-add (+ lane-broadcast bias)
    o_ref[0] = out.astype(o_ref.dtype)                        # single unmasked store


def _largest_batch_fold(n, c):
    """Fold batches into the sublane/row dim until the 8 f32 sublanes are filled."""
    if c >= 8:
        return 1
    for f in range(min(n, max(1, 8 // c)), 0, -1):
        if n % f == 0:
            return f
    return 1


def _pick_spatial_tile(hw_padded, rows, itemsize, budget_bytes=2 << 20):
    """Lane-dense (multiple-of-128) spatial tile under a per-buffer byte budget.

    budget_bytes bounds one (rows, tile) buffer; with double-buffered input +
    output (~4 live buffers) this stays well under v5e's 16 MiB and v7x's
    32 MiB default scoped-VMEM limits without vmem_limit_bytes overrides.
    """
    max_elems = max(128, budget_bytes // max(1, rows * itemsize))
    tile = min(hw_padded, max(128, (max_elems // 128) * 128))
    while hw_padded % tile:
        tile -= 128
    return tile


def residual_forward(x_nchw, w, b, gamma):
    """out = x + gamma * conv1x1(x);  x: (N, C, H, W), w: (Cout=C, Cin=C), b: (C,)."""
    N, C, H, W = x_nchw.shape
    HW = H * W

    # Fold gamma into the parameters (touches C*C + C scalars, not activations).
    g = gamma.reshape(()).astype(jnp.float32)
    wg = g * w.astype(jnp.float32)
    bg = g * b.astype(jnp.float32)

    # Fold batches into the row dimension; weight becomes block-diagonal.
    fold = _largest_batch_fold(N, C)
    G, R = N // fold, fold * C
    w_bd = jnp.kron(jnp.eye(fold, dtype=jnp.float32), wg)    # (R, R)
    b_bd = jnp.tile(bg, fold).reshape(R, 1)                  # (R, 1)

    # NCHW -> (G, R, HW): a free reshape (no transpose); spatial maps to lanes.
    x3 = x_nchw.reshape(G, R, HW)

    # Lane-density guard: pad H*W up to a multiple of 128 if necessary.
    HWp = ((HW + 127) // 128) * 128
    if HWp != HW:
        x3 = jnp.pad(x3, ((0, 0), (0, 0), (0, HWp - HW)))

    tile = _pick_spatial_tile(HWp, R, x3.dtype.itemsize)
    grid = (G, HWp // tile)          # collapses to (1, 1) at the shipped shape

    out3 = pl.pallas_call(
        residual_kernel,
        out_shape=jax.ShapeDtypeStruct((G, R, HWp), x3.dtype),
        grid=grid,
        in_specs=[
            pl.BlockSpec((1, R, tile), lambda gi, si: (gi, 0, si)),  # activations
            pl.BlockSpec((R, R), lambda gi, si: (0, 0)),             # weight (VMEM)
            pl.BlockSpec((R, 1), lambda gi, si: (0, 0)),             # bias   (VMEM)
        ],
        out_specs=pl.BlockSpec((1, R, tile), lambda gi, si: (gi, 0, si)),
        compiler_params=pltpu.CompilerParams(
            dimension_semantics=("parallel", "parallel")),
    )(x3, w_bd, b_bd)

    if HWp != HW:
        out3 = out3[:, :, :HW]
    return out3.reshape(N, C, H, W)


if __name__ == "__main__":
    key = jax.random.PRNGKey(0)
    kx, kw, kb = jax.random.split(key, 3)

    N, C, H, W = 2, 4, 16, 16
    x = jax.random.normal(kx, (N, C, H, W), dtype=jnp.float32)

    # Representative residual branch = Conv2d(C, C, kernel_size=1):
    #   weight (Cout, Cin, 1, 1) squeezed to (Cout, Cin), bias (C,)
    w = jax.random.normal(kw, (C, C), dtype=jnp.float32) * 0.1
    b = jax.random.normal(kb, (C,), dtype=jnp.float32) * 0.1

    def ref_forward(x, w, b, gamma):
        r = jnp.einsum('oc,nchw->nohw', w, x) + b[None, :, None, None]
        return x + gamma[0] * r

    # (a) module init: gamma == zeros(1) -> output must equal input
    gamma0 = jnp.zeros((1,), dtype=jnp.float32)
    out0 = jax.block_until_ready(residual_forward(x, w, b, gamma0))
    assert out0.shape == x.shape and out0.dtype == x.dtype
    assert jnp.allclose(out0, x, atol=1e-6)

    # (b) nonzero gamma so weight/bias handling is actually exercised
    gamma1 = jnp.array([0.7], dtype=jnp.float32)
    out1 = jax.block_until_ready(residual_forward(x, w, b, gamma1))
    ref1 = ref_forward(x, w, b, gamma1)
    assert out1.shape == x.shape and out1.dtype == x.dtype
    assert jnp.allclose(out1, ref1, atol=1e-5, rtol=1e-5)

    print("KERNEL_OK")
</pallas_src>

<mosaic_0001>
module attributes {stable_mosaic.version = 11 : i64} {
  func.func @residual_kernel(%arg0: i32, %arg1: i32, %arg2: memref<1x8x256xf32, #tpu.memory_space<vmem>>, %arg3: memref<8x8xf32, #tpu.memory_space<vmem>>, %arg4: memref<8x1xf32, #tpu.memory_space<vmem>>, %arg5: memref<1x8x256xf32, #tpu.memory_space<vmem>>) attributes {dimension_semantics = [#tpu.dimension_semantics<parallel>, #tpu.dimension_semantics<parallel>], iteration_bounds = array<i64: 1, 1>, scalar_prefetch = 0 : i64, scratch_operands = 0 : i64, tpu.core_type = #tpu.core_type<tc>, window_params = [{transform_indices = @transform_0, window_bounds = array<i64: 1, 8, 256>}, {pipeline_mode = #tpu.pipeline_mode<synchronous>, transform_indices = @transform_1, window_bounds = array<i64: 8, 8>}, {pipeline_mode = #tpu.pipeline_mode<synchronous>, transform_indices = @transform_2, window_bounds = array<i64: 8, 1>}, {transform_indices = @transform_3, window_bounds = array<i64: 1, 8, 256>}]} {
    %c0 = arith.constant 0 : index
    %c0_0 = arith.constant 0 : index
    %c0_1 = arith.constant 0 : index
    %0 = vector.load %arg2[%c0, %c0_0, %c0_1] : memref<1x8x256xf32, #tpu.memory_space<vmem>>, vector<1x8x256xf32>
    %1 = vector.shape_cast %0 : vector<1x8x256xf32> to vector<8x256xf32>
    %c0_2 = arith.constant 0 : index
    %c0_3 = arith.constant 0 : index
    %2 = vector.load %arg3[%c0_2, %c0_3] : memref<8x8xf32, #tpu.memory_space<vmem>>, vector<8x8xf32>
    %cst = arith.constant dense<0.000000e+00> : vector<8x256xf32>
    %3 = tpu.matmul %2, %1, %cst {dimension_numbers = #tpu.dot_dimension_numbers<[1], [0], [0], [1], [0, 0, 1, 1], [], []>} : vector<8x8xf32>, vector<8x256xf32>, vector<8x256xf32> -> vector<8x256xf32>
    %4 = arith.addf %1, %3 : vector<8x256xf32>
    %c0_4 = arith.constant 0 : index
    %c0_5 = arith.constant 0 : index
    %5 = vector.load %arg4[%c0_4, %c0_5] : memref<8x1xf32, #tpu.memory_space<vmem>>, vector<8x1xf32>
    %6 = vector.broadcast %5 : vector<8x1xf32> to vector<8x256xf32>
    %7 = arith.addf %4, %6 : vector<8x256xf32>
    %c0_6 = arith.constant 0 : index
    %c0_7 = arith.constant 0 : index
    %c0_8 = arith.constant 0 : index
    %8 = vector.load %arg5[%c0_6, %c0_7, %c0_8] : memref<1x8x256xf32, #tpu.memory_space<vmem>>, vector<1x8x256xf32>
    %9 = vector.shape_cast %8 : vector<1x8x256xf32> to vector<8x256xf32>
    %10 = vector.shape_cast %7 : vector<8x256xf32> to vector<1x8x256xf32>
    tpu.vector_store %arg5[%c0_6, %c0_7, %c0_8], %10 {strides = array<i32>} : memref<1x8x256xf32, #tpu.memory_space<vmem>>, vector<1x8x256xf32>,
    return
  }
  func.func @transform_0(%arg0: i32, %arg1: i32) -> (i32, i32, i32) {
    %c0_i32 = arith.constant 0 : i32
    %c0_i32_0 = arith.constant 0 : i32
    return %arg0, %c0_i32, %arg1 : i32, i32, i32
  }
  func.func @transform_1(%arg0: i32, %arg1: i32) -> (i32, i32) {
    %c0_i32 = arith.constant 0 : i32
    %c0_i32_0 = arith.constant 0 : i32
    %c0_i32_1 = arith.constant 0 : i32
    return %c0_i32, %c0_i32_0 : i32, i32
  }
  func.func @transform_2(%arg0: i32, %arg1: i32) -> (i32, i32) {
    %c0_i32 = arith.constant 0 : i32
    %c0_i32_0 = arith.constant 0 : i32
    %c0_i32_1 = arith.constant 0 : i32
    return %c0_i32, %c0_i32_0 : i32, i32
  }
  func.func @transform_3(%arg0: i32, %arg1: i32) -> (i32, i32, i32) {
    %c0_i32 = arith.constant 0 : i32
    %c0_i32_0 = arith.constant 0 : i32
    return %arg0, %c0_i32, %arg1 : i32, i32, i32
  }
}

</mosaic_0001>

<bundles_post_ra>
// kernel: tpu_custom_call.1
= control target key start
LH: loop header
LB: loop body
LE: loop exit
PB: predicated region body
PF: predicated region fallthrough
CT: control target
= control target key end

     0   :  { %8 = vsyncpa [#allocation3], 0  ;;  %s198_s0 = inlined_call_operand.hbm [shape: f32[1,8,256], index: 0, kind: input, shape index: {}]   ;;  %s199_s1 = inlined_call_operand.vmem [shape: f32[8,8], index: 1, kind: input, shape index: {}]   ;;  %s200_s2 = inlined_call_operand.vmem [shape: f32[8,1], index: 2, kind: input, shape index: {}]   ;;  %s201_s3 = inlined_call_operand.hbm [shape: f32[1,8,256], index: 3, kind: output, shape index: {}]  }
   0x1   :  { %9 = vsyncpa [#allocation4], 0  ;;  %s15_s14 = sshll.u32 %s198_s0, 4  ;;  %s163_s15 = smov [#allocation2]   ;;  %s16_s14 = int_to_ptr.hbm [resolvable:$true] %s15_s14 }
   0x2   :  { %s17_s16 = sshll.u32 %s163_s15, 4  ;;  %s18_s16 = int_to_ptr.vmem [resolvable:$true] %s17_s16 }
   0x3   :  { %20 = dma.hbm_to_vmem [thread:$0]  %s16_s14, 256, %s18_s16, [#allocation3]  }
   0x4   :  { %159 = dma.done.wait [#allocation3], 256  }
   0x5   :  { %160 = vsyncadd [#allocation3], 4294967040  ;;  %v164_v0 = vmov 0   ;;  %vm32_vm0 = vcmask 64512   ;;  %v29_v1 = vld [vmem:[#allocation2] sm:$0xff]  ;;  %v30_v2 = vld [vmem:[#allocation2 + $0x8] sm:$0xff] }
   0x6   :  { %110 = vset.pattern.permute.xlu0 %v164_v0  ;;  %v31_v3 = vld [vmem:[%s199_s1] sm:$0xff]  ;;  %51 = vmatpush.msra.mxu0 %v29_v1  ;;  %s165_s20 = smov [#allocation5]   ;;  %s95_s1 = sshll.u32 %s201_s3, 4  ;;  %s96_s1 = int_to_ptr.hbm [resolvable:$true] %s95_s1 }
   0x7   :  { %71 = vmatpush.msra.mxu1 %v30_v2  ;;  %v78_v4 = vld [vmem:[%s200_s2] sm:$0xff]  ;;  %105 = vmatmul.msk.f32.vlgmr.msra.gmra.mxu0 %vm32_vm0, %v31_v3  ;;  %s93_s21 = sshll.u32 %s165_s20, 4  ;;  %s94_s21 = int_to_ptr.vmem [resolvable:$true] %s93_s21 }
   0x8   :  { %106 = vmatmul.msk.f32.vlgmr.msra.gmra.mxu1 %vm32_vm0, %v31_v3  ;;  %81 = vperm.xlu0 %110, %v78_v4  }
  0x7a   :  { %v82_v5 = vpop.permute.xlu0 %81 }
  0x84   :  { %v53_v6 = vpop.f32.mrf.mxu0 }
  0x85   :  { %v73_v7 = vpop.f32.mrf.mxu1  ;;  %v76_v8 = vadd.f32 %v53_v6, %v29_v1 }
  0x86   :  { %v77_v9 = vadd.f32 %v73_v7, %v30_v2 }
  0x87   :  { %v84_v10 = vadd.f32 %v82_v5, %v76_v8 }
  0x88   :  { %v85_v11 = vadd.f32 %v82_v5, %v77_v9 }
  0x89   :  { %86 = vst [vmem:[#allocation5] sm:$0xff] %v84_v10 }
  0x8a   :  { %87 = vst [vmem:[#allocation5 + $0x8] sm:$0xff] %v85_v11 }
  0x8b   :  { %98 = dma.vmem_to_hbm [thread:$0]  %s94_s21, 256, %s96_s1, [#allocation4]  }
  0x8c   :  { %161 = dma.done.wait [#allocation4], 256  }
  0x8d   :  { %162 = vsyncadd [#allocation4], 4294967040 }
  0x8e   :  { %103 = vsyncpa [#allocation3], 1 }
  0x8f   :  { %104 = vsyncpa [#allocation4], 1 }

</bundles_post_ra>
